<compile_context>
chip_gen: v6e
topology: v6e:2x2x1
jax: 0.10.0
libtpu: 0.0.40
codegen_flags: <defaults>
</compile_context>

<pallas_src>
import jax
import jax.numpy as jnp
from jax.experimental import pallas as pl
from jax.experimental.pallas import tpu as pltpu


def _round_up(n, m):
    return ((n + m - 1) // m) * m


# ----------------------- kernel A: fc1 K-stream + relu -----------------------
def _fc1_stream_kernel(x_ref, w1_ref, b1_ref, h1_ref, acc_ref):
    """grid = (n_col_blocks [parallel], nk [arbitrary reduction])."""
    k = pl.program_id(1)

    @pl.when(k == 0)
    def _init():
        acc_ref[...] = jnp.zeros_like(acc_ref)

    # Stream-and-accumulate one (BP, TK) x tile against one (TK, TN1) W1 tile.
    # W1 may be bf16 on HBM; upcast to f32 so accumulation matches the f32 ref.
    acc_ref[...] += jnp.dot(x_ref[...], w1_ref[...].astype(jnp.float32),
                            preferred_element_type=jnp.float32)

    @pl.when(k == pl.num_programs(1) - 1)
    def _finalize():
        h1_ref[...] = jnp.maximum(acc_ref[...] + b1_ref[...], 0.0)


# ------------------- kernel B: fc2 -> relu -> fc3 -> softmax -----------------
def _mlp_softmax_kernel(h1_ref, w2_ref, b2_ref, w3_ref, b3_ref, o_ref):
    h2 = jnp.dot(h1_ref[...], w2_ref[...], preferred_element_type=jnp.float32)
    h2 = jnp.maximum(h2 + b2_ref[...], 0.0)                       # (BP, 256)
    logits = jnp.dot(h2, w3_ref[...], preferred_element_type=jnp.float32)
    logits = logits + b3_ref[...]                                 # (BP, LP)
    # Padded label columns carry bias -1e30 -> exp underflows to exactly 0.
    m = jnp.max(logits, axis=1, keepdims=True)
    e = jnp.exp(logits - m)
    # Exact division (not approx reciprocal): rows sum to 1 to f32 precision.
    o_ref[...] = (e / jnp.sum(e, axis=1, keepdims=True)).astype(o_ref.dtype)


# --------------------------- one-time parameter prep -------------------------
def prepare_head_params(params, *, tk=6144, n_col_blocks=2,
                        weight_dtype=jnp.bfloat16):
    """Pad / cast parameters into kernel layout ONCE (call at model-load time).

    params:        (w1, b1, w2, b2, w3, b3) with weights stored (in, out).
    tk:            K-tile along the flattened feature axis (rounded to 128).
                   Default 6144; 3072 divides the real F = 768*964 exactly.
    n_col_blocks:  fc1 output-column blocks (leading "parallel" grid axis).
                   Use 2 on v7x to drive both TensorCores; 1 or 2 elsewhere.
    weight_dtype:  bf16 (default: halves the W1 HBM stream) or f32 (bit-exact).
    """
    w1, b1, w2, b2, w3, b3 = params
    F, H1 = w1.shape
    H2, L = w3.shape
    assert w2.shape == (H1, H2)
    assert H1 % n_col_blocks == 0 and (H1 // n_col_blocks) % 128 == 0, \
        "fc1 column blocks must be lane multiples"

    TK = min(_round_up(max(tk, 128), 128), _round_up(F, 128))
    FP = _round_up(F, TK)
    nk = FP // TK
    TN1 = H1 // n_col_blocks
    LP = _round_up(max(L, 128), 128)

    # Pad W1 rows (one time) and cast to the streaming dtype (one time).
    w1p = w1 if FP == F else jnp.zeros((FP, H1), w1.dtype).at[:F, :].set(w1)
    w1p = w1p.astype(weight_dtype)

    w3p = jnp.zeros((H2, LP), jnp.float32).at[:, :L].set(w3.astype(jnp.float32))
    b3p = jnp.full((1, LP), -1e30, jnp.float32).at[:, :L].set(
        b3.reshape(1, L).astype(jnp.float32))

    return {
        "w1": w1p,
        "b1": b1.reshape(1, H1).astype(jnp.float32),
        "w2": w2.astype(jnp.float32),
        "b2": b2.reshape(1, H2).astype(jnp.float32),
        "w3": w3p,
        "b3": b3p,
        # static metadata
        "F": F, "FP": FP, "TK": TK, "nk": nk,
        "H1": H1, "H2": H2, "L": L, "LP": LP,
        "TN1": TN1, "n_col_blocks": n_col_blocks,
    }


# --------------------------------- forward -----------------------------------
def classification_head(hidden_states, prepared, *, stream_buffers=2,
                        vmem_limit_bytes=48 << 20):
    """hidden_states: (B, SEQ, HIDDEN) -> probs: (B, num_labels) f32.

    `prepared` comes from prepare_head_params (padding/casting is NOT redone
    per call).  Per-call glue only batch/feature-pads the tiny activation x.
    """
    F, FP, TK, nk = prepared["F"], prepared["FP"], prepared["TK"], prepared["nk"]
    H1, H2, LP, L = prepared["H1"], prepared["H2"], prepared["LP"], prepared["L"]
    TN1, ncb = prepared["TN1"], prepared["n_col_blocks"]

    B = hidden_states.shape[0]
    x = hidden_states.reshape(B, -1).astype(jnp.float32)   # view(B, -1)
    assert x.shape[1] == F, "hidden_states do not match prepared fc1 weights"

    BP = _round_up(max(B, 8), 8)                            # sublane multiple
    if (BP, FP) != (B, F):
        x = jnp.zeros((BP, FP), jnp.float32).at[:B, :F].set(x)

    # Streamed specs (x tile + W1 tile); optional deeper pipelining.
    x_idx = lambda j, k: (0, k)
    w1_idx = lambda j, k: (k, j)
    if stream_buffers > 2:
        x_spec = pl.BlockSpec((BP, TK), x_idx,
                              pipeline_mode=pl.Buffered(stream_buffers))
        w1_spec = pl.BlockSpec((TK, TN1), w1_idx,
                               pipeline_mode=pl.Buffered(stream_buffers))
    else:
        x_spec = pl.BlockSpec((BP, TK), x_idx)
        w1_spec = pl.BlockSpec((TK, TN1), w1_idx)

    # ---- kernel A: fc1 (the whole cost: streams W1 from HBM) ----
    h1 = pl.pallas_call(
        _fc1_stream_kernel,
        out_shape=jax.ShapeDtypeStruct((BP, H1), jnp.float32),
        grid_spec=pltpu.PrefetchScalarGridSpec(
            num_scalar_prefetch=0,
            grid=(ncb, nk),
            in_specs=[
                x_spec,                                         # x  (streamed)
                w1_spec,                                        # W1 (streamed)
                pl.BlockSpec((1, TN1), lambda j, k: (0, j)),    # b1 (resident)
            ],
            out_specs=pl.BlockSpec((BP, TN1), lambda j, k: (0, j)),
            scratch_shapes=[pltpu.VMEM((BP, TN1), jnp.float32)],
        ),
        compiler_params=pltpu.CompilerParams(
            dimension_semantics=("parallel", "arbitrary"),
            vmem_limit_bytes=vmem_limit_bytes),
    )(x, prepared["w1"], prepared["b1"])

    # ---- kernel B: tiny fc2/fc3/softmax epilogue (single shot) ----
    probs_padded = pl.pallas_call(
        _mlp_softmax_kernel,
        out_shape=jax.ShapeDtypeStruct((BP, LP), jnp.float32),
        grid_spec=pltpu.PrefetchScalarGridSpec(
            num_scalar_prefetch=0,
            grid=(1,),
            in_specs=[
                pl.BlockSpec((BP, H1), lambda i: (0, 0)),
                pl.BlockSpec((H1, H2), lambda i: (0, 0)),
                pl.BlockSpec((1, H2), lambda i: (0, 0)),
                pl.BlockSpec((H2, LP), lambda i: (0, 0)),
                pl.BlockSpec((1, LP), lambda i: (0, 0)),
            ],
            out_specs=pl.BlockSpec((BP, LP), lambda i: (0, 0)),
        ),
        compiler_params=pltpu.CompilerParams(
            dimension_semantics=("arbitrary",)),
    )(h1, prepared["w2"], prepared["b2"], prepared["w3"], prepared["b3"])

    return probs_padded[:B, :L]


# --------------------------- parameter construction --------------------------
def init_params(key, flat_dim, h1, h2, num_labels):
    """Mimics torch.nn.Linear default init: U(-k, k), k = 1/sqrt(fan_in).
    Weights are stored (in, out) so the kernels compute y = x @ W + b."""
    ks = jax.random.split(key, 6)

    def linear(kw, kb, fan_in, fan_out):
        bound = 1.0 / jnp.sqrt(jnp.float32(fan_in))
        w = jax.random.uniform(kw, (fan_in, fan_out), jnp.float32, -bound, bound)
        b = jax.random.uniform(kb, (1, fan_out), jnp.float32, -bound, bound)
        return w, b

    w1, b1 = linear(ks[0], ks[1], flat_dim, h1)
    w2, b2 = linear(ks[2], ks[3], h1, h2)
    w3, b3 = linear(ks[4], ks[5], h2, num_labels)
    return (w1, b1, w2, b2, w3, b3)


# ------------------------------------ main ------------------------------------
if __name__ == "__main__":
    # Small stand-ins for (hidden_size=768, seq=964, num_labels=len(unique_labels)).
    B, SEQ, HIDDEN = 2, 8, 32          # hubert last_hidden_state: (B, SEQ, HIDDEN)
    H1, H2 = 512, 256                  # fc1 / fc2 widths from the module
    NUM_LABELS = 4

    key = jax.random.PRNGKey(0)
    k_hs, k_params = jax.random.split(key)

    # Synthetic "last_hidden_state" standing in for the HuBERT encoder output.
    hidden_states = jax.random.normal(k_hs, (B, SEQ, HIDDEN), dtype=jnp.float32)
    params = init_params(k_params, SEQ * HIDDEN, H1, H2, NUM_LABELS)

    # One-time prep (tk=128 forces nk=2 at the toy F=256 so the K-accumulate
    # path is exercised; at the real HuBERT size use tk=3072..16384).
    prep_bf16 = prepare_head_params(params, tk=128, n_col_blocks=2)           # default bf16 stream
    prep_f32 = prepare_head_params(params, tk=128, n_col_blocks=2,
                                   weight_dtype=jnp.float32)                  # bit-exact path

    probs = jax.block_until_ready(classification_head(hidden_states, prep_bf16))
    probs_f32 = jax.block_until_ready(classification_head(hidden_states, prep_f32))

    # Sanity: shape and rows summing to ~1 (exact-division softmax).
    assert probs.shape == (B, NUM_LABELS)
    assert bool(jnp.all(jnp.abs(jnp.sum(probs, axis=1) - 1.0) < 1e-5))
    assert bool(jnp.all(jnp.abs(jnp.sum(probs_f32, axis=1) - 1.0) < 1e-5))

    # Plain-JAX reference of the same head (f32).
    w1, b1, w2, b2, w3, b3 = params
    x = hidden_states.reshape(B, -1)
    ref = jnp.maximum(x @ w1 + b1, 0.0)
    ref = jnp.maximum(ref @ w2 + b2, 0.0)
    ref = jax.nn.softmax(ref @ w3 + b3, axis=1)
    assert bool(jnp.all(jnp.abs(probs_f32 - ref) < 1e-5))        # f32 path: tight

    # bf16-weight path: compare against a reference with the same W1 quantization.
    w1q = w1.astype(jnp.bfloat16).astype(jnp.float32)
    refq = jnp.maximum(x @ w1q + b1, 0.0)
    refq = jnp.maximum(refq @ w2 + b2, 0.0)
    refq = jax.nn.softmax(refq @ w3 + b3, axis=1)
    assert bool(jnp.all(jnp.abs(probs - refq) < 1e-4))

    print("KERNEL_OK")
</pallas_src>

<mosaic_0001>
module attributes {stable_mosaic.version = 11 : i64} {
  func.func @_fc1_stream_kernel(%arg0: i32, %arg1: i32, %arg2: memref<8x128xf32, #tpu.memory_space<vmem>>, %arg3: memref<128x256xbf16, #tpu.memory_space<vmem>>, %arg4: memref<1x256xf32, #tpu.memory_space<vmem>>, %arg5: memref<8x256xf32, #tpu.memory_space<vmem>>, %arg6: memref<8x256xf32, #tpu.memory_space<vmem>>) attributes {dimension_semantics = [#tpu.dimension_semantics<parallel>, #tpu.dimension_semantics<arbitrary>], iteration_bounds = array<i64: 2, 2>, scalar_prefetch = 0 : i64, scratch_operands = 1 : i64, tpu.core_type = #tpu.core_type<tc>, window_params = [{transform_indices = @transform_0, window_bounds = array<i64: 8, 128>}, {transform_indices = @transform_1, window_bounds = array<i64: 128, 256>}, {transform_indices = @transform_2, window_bounds = array<i64: 1, 256>}, {transform_indices = @transform_3, window_bounds = array<i64: 8, 256>}]} {
    %c0_i32 = arith.constant 0 : i32
    %0 = arith.cmpi eq, %arg1, %c0_i32 : i32
    %1 = arith.extui %0 : i1 to i32
    %c0_i32_0 = arith.constant 0 : i32
    %2 = arith.cmpi ne, %1, %c0_i32_0 : i32
    scf.if %2 {
      %cst_9 = arith.constant 0.000000e+00 : f32
      %13 = vector.broadcast %cst_9 : f32 to vector<8x256xf32>
      %c0_10 = arith.constant 0 : index
      %c0_11 = arith.constant 0 : index
      %14 = vector.load %arg6[%c0_10, %c0_11] : memref<8x256xf32, #tpu.memory_space<vmem>>, vector<8x256xf32>
      tpu.vector_store %arg6[%c0_10, %c0_11], %13 {strides = array<i32>} : memref<8x256xf32, #tpu.memory_space<vmem>>, vector<8x256xf32>,
    } else {
    }
    %c0 = arith.constant 0 : index
    %c0_1 = arith.constant 0 : index
    %3 = vector.load %arg6[%c0, %c0_1] : memref<8x256xf32, #tpu.memory_space<vmem>>, vector<8x256xf32>
    %c0_2 = arith.constant 0 : index
    %c0_3 = arith.constant 0 : index
    %4 = vector.load %arg2[%c0_2, %c0_3] : memref<8x128xf32, #tpu.memory_space<vmem>>, vector<8x128xf32>
    %c0_4 = arith.constant 0 : index
    %c0_5 = arith.constant 0 : index
    %5 = vector.load %arg3[%c0_4, %c0_5] : memref<128x256xbf16, #tpu.memory_space<vmem>>, vector<128x256xbf16>
    %6 = arith.extf %5 : vector<128x256xbf16> to vector<128x256xf32>
    %cst = arith.constant dense<0.000000e+00> : vector<8x256xf32>
    %7 = tpu.matmul %4, %6, %cst {dimension_numbers = #tpu.dot_dimension_numbers<[1], [0], [0], [1], [0, 0, 1, 1], [], []>} : vector<8x128xf32>, vector<128x256xf32>, vector<8x256xf32> -> vector<8x256xf32>
    %8 = arith.addf %3, %7 : vector<8x256xf32>
    %c0_6 = arith.constant 0 : index
    %c0_7 = arith.constant 0 : index
    %9 = vector.load %arg6[%c0_6, %c0_7] : memref<8x256xf32, #tpu.memory_space<vmem>>, vector<8x256xf32>
    tpu.vector_store %arg6[%c0_6, %c0_7], %8 {strides = array<i32>} : memref<8x256xf32, #tpu.memory_space<vmem>>, vector<8x256xf32>,
    %c1_i32 = arith.constant 1 : i32
    %10 = arith.cmpi eq, %arg1, %c1_i32 : i32
    %11 = arith.extui %10 : i1 to i32
    %c0_i32_8 = arith.constant 0 : i32
    %12 = arith.cmpi ne, %11, %c0_i32_8 : i32
    scf.if %12 {
      %c0_9 = arith.constant 0 : index
      %c0_10 = arith.constant 0 : index
      %13 = vector.load %arg6[%c0_9, %c0_10] : memref<8x256xf32, #tpu.memory_space<vmem>>, vector<8x256xf32>
      %c0_11 = arith.constant 0 : index
      %c0_12 = arith.constant 0 : index
      %14 = vector.load %arg4[%c0_11, %c0_12] : memref<1x256xf32, #tpu.memory_space<vmem>>, vector<1x256xf32>
      %15 = vector.broadcast %14 : vector<1x256xf32> to vector<8x256xf32>
      %16 = arith.addf %13, %15 : vector<8x256xf32>
      %cst_13 = arith.constant 0.000000e+00 : f32
      %17 = vector.broadcast %cst_13 : f32 to vector<8x256xf32>
      %18 = arith.maximumf %16, %17 : vector<8x256xf32>
      %c0_14 = arith.constant 0 : index
      %c0_15 = arith.constant 0 : index
      %19 = vector.load %arg5[%c0_14, %c0_15] : memref<8x256xf32, #tpu.memory_space<vmem>>, vector<8x256xf32>
      tpu.vector_store %arg5[%c0_14, %c0_15], %18 {strides = array<i32>} : memref<8x256xf32, #tpu.memory_space<vmem>>, vector<8x256xf32>,
    } else {
    }
    return
  }
  func.func @transform_0(%arg0: i32, %arg1: i32) -> (i32, i32) {
    %c0_i32 = arith.constant 0 : i32
    %c0_i32_0 = arith.constant 0 : i32
    return %c0_i32, %arg1 : i32, i32
  }
  func.func @transform_1(%arg0: i32, %arg1: i32) -> (i32, i32) {
    %c0_i32 = arith.constant 0 : i32
    return %arg1, %arg0 : i32, i32
  }
  func.func @transform_2(%arg0: i32, %arg1: i32) -> (i32, i32) {
    %c0_i32 = arith.constant 0 : i32
    %c0_i32_0 = arith.constant 0 : i32
    return %c0_i32, %arg0 : i32, i32
  }
  func.func @transform_3(%arg0: i32, %arg1: i32) -> (i32, i32) {
    %c0_i32 = arith.constant 0 : i32
    %c0_i32_0 = arith.constant 0 : i32
    return %c0_i32, %arg0 : i32, i32
  }
}

</mosaic_0001>

<bundles_post_ra>
// kernel: tpu_custom_call.1
= control target key start
LH: loop header
LB: loop body
LE: loop exit
PB: predicated region body
PF: predicated region fallthrough
CT: control target
= control target key end

     0   :  { %s1368_s0 = inlined_call_operand.hbm [shape: f32[8,256], index: 0, kind: input, shape index: {}]   ;;  %s1369_s1 = inlined_call_operand.hbm [shape: bf16[256,512], index: 1, kind: input, shape index: {}]   ;;  %s1370_s2 = inlined_call_operand.hbm [shape: f32[1,512], index: 2, kind: input, shape index: {}]   ;;  %s1371_s3 = inlined_call_operand.hbm [shape: f32[8,512], index: 3, kind: output, shape index: {}]  }
   0x1   :  { %1380 = sst [smem:[#allocation21_spill]] %s1368_s0 }
   0x2   :  { %1381 = sst [smem:[#allocation22_spill]] %s1369_s1 }
   0x3   :  { %1382 = sst [smem:[#allocation23_spill]] %s1371_s3 }
   0x4   :  { %8 = vsyncpa [#allocation4], 0 }
   0x5   :  { %10 = vsyncpa [#allocation4 + $0x1], 0 }
   0x6   :  { %11 = vsyncpa [#allocation7], 0 }
   0x7   :  { %13 = vsyncpa [#allocation7 + $0x1], 0 }
   0x8   :  { %14 = vsyncpa [#allocation5], 0 }
   0x9   :  { %16 = vsyncpa [#allocation5 + $0x1], 0  ;;  %s1017_s12 = smov 0   ;;  %s1019_s13 = smov 0  }
   0xa   :  { %s1021_s14 = smov 0   ;;  %s1023_s15 = smov 0  }
   0xb   :  { %s1025_s16 = smov 0   ;;  %s1027_s17 = smov 0  }
   0xc   :  { %s1029_s18 = smov 0   ;;  %s1031_s19 = smov 0  }
   0xd   :  { %s1033_s20 = smov 0   ;;  %s1035_s21 = smov 0  }
   0xe   :  { %s1037_s22 = smov 0   ;;  %s1039_s23 = smov 0  }
   0xf   :  { %s1041_s24 = smov 0   ;;  %s1043_s25 = smov 0  }
  0x10 LB: > { %1383 = sst [smem:[#allocation14_spill]] %s966_s20  ;;  %p49_p0 = scmp.eq.s32.totalorder %s986_s25, 0  ;;  %s986_s25 = sphi %s1043_s25, %s22_s25   ;;  %s982_s24 = sphi %s1041_s24, %s1418_s24   ;;  %s978_s23 = sphi %s1039_s23, %s1429_s23   ;;  %s974_s22 = sphi %s1037_s22, %s1428_s22   ;;  %s970_s21 = sphi %s1035_s21, %s1427_s21   ;;  %s966_s20 = sphi %s1033_s20, %s1415_s20   ;;  %s962_s19 = sphi %s1031_s19, %s1426_s19   ;;  %s958_s18 = sphi %s1029_s18, %s1425_s18   ;;  %s954_s17 = sphi %s1027_s17, %s1424_s17   ;;  %s950_s16 = sphi %s1025_s16, %s1423_s16   ;;  %s946_s15 = sphi %s1023_s15, %s1422_s15   ;;  %s942_s14 = sphi %s1021_s14, %s1421_s14   ;;  %s938_s13 = sphi %s1019_s13, %s1420_s13   ;;  %s934_s12 = sphi %s1017_s12, %s1419_s12  }
  0x11   : > { %1384 = sst [smem:[#allocation15_spill]] %s970_s21  ;;  %p76_p1 = scmp.ne.s32.totalorder %s954_s17, %s950_s16 }
  0x12   : > { %1385 = sst [smem:[#allocation16_spill]] %s974_s22  ;;  %p82_p2 = scmp.ne.s32.totalorder %s950_s16, %s946_s15 }
  0x13   : > { %1386 = sst [smem:[#allocation17_spill]] %s982_s24  ;;  %p78_p3 = por %p76_p1, %p49_p0 }
  0x14   : > { %p631_p4 = scmp.lt.s32.totalorder %s986_s25, 4  ;;  %s176_s28 = sand.u32 1, %s986_s25  }
  0x15   : > { %s178_s29 = sand.u32 1, %s954_s17   ;;  %s588_s4 = sshll.u32 %s982_s24, 1 }
  0x16   : > { %s586_s30 = sshll.u32 %s178_s29, 7  ;;  %s606_s5 = sshll.u32 %s978_s23, 6 }
  0x17   : > { %s180_s6 = scalar_lea.vmem [#allocation6], %s586_s30  ;;  %s187_s8 = sadd.s32 %s606_s5, %s588_s4 }
  0x18   : > { %s190_s7 = sshll.u32 %s180_s6, 4  ;;  %s590_s9 = sshll.u32 %s187_s8, 6  ;;  %s191_s7 = int_to_ptr.vmem [resolvable:$true] %s190_s7 }
  0x19   : > { %p1103_p5 = pnand %p631_p4, %p78_p3  ;;  %s1388_s1 = sld [smem:[#allocation22_spill]] }
  0x1a   : > { %p594_p6 = scmp.ge.s32.totalorder %s986_s25, 1  ;;  %s1111_s3 = scalar_lea.sflag [#allocation7], %s176_s28 }
  0x1b   : > { %p752_p7 = pneg %p1103_p5  ;;  %s763_s29 = scalar_lea.vmem %s191_s7, 2048 }
  0x1c   : > { %p764_p8 = scmp.ne.s32.totalorder %s191_s7, %s763_s29  ;;  %s988_s30 = smov [#allocation6]  }
  0x1d   : > { %s768_s4 = sshll.u32 %s988_s30, 4  ;;  %s769_s4 = int_to_ptr.vmem [resolvable:$false] %s768_s4 }
  0x1e   : > { %p766_p9 = pnand %p764_p8, %p752_p7  ;;  %s770_s5 = scalar_lea.vmem %s769_s4, 4096 }
  0x1f   : > { %s189_s26 = scalar_lea.hbm %s1388_s1, %s590_s9  ;;  %p771_p11 = scmp.lt.s32.totalorder %s191_s7, %s769_s4 }
  0x20   : > { %p767_p10 = pneg %p766_p9  ;;  %p772_p12 = scmp.lt.s32.totalorder %s770_s5, %s763_s29 }
  0x22   : > { %p773_p13 = por %p772_p12, %p771_p11 }
  0x24   : > { %p774_p1 = pnand %p773_p13, %p767_p10 }
  0x26   : > { %777 = shalt.err (!%p774_p1)
}
  0x27   : > { %s989_s27 = smov 256   ;;  %s990_s28 = smov 128  }
  0x28   : > { %s991_s6 = smov 8   ;;  %p217_p3 = scmp.lt.s32.totalorder %s986_s25, 5 }
  0x29   : > { %623 = dma.hbm_to_vmem [thread:$0]  (!%p1103_p5), %s189_s26, 2048, %s191_s7, %s1111_s3, %s989_s27, %s990_s28, %s991_s6  }
  0x2a   : > { %p1121_p7 = pnand %p594_p6, %p217_p3  ;;  %s1126_s9 = sadd.s32 4294967295, %s986_s25  }
  0x2b   : > { %s31_s11 = sadd.s32 1, %s978_s23  ;;  %s41_s29 = sadd.s32 1, %s966_s20 }
  0x2c   : > { %p32_p8 = scmp.ge.s32.totalorder %s31_s11, 2  ;;  %p48_p5 = scmp.ne.s32.totalorder %s966_s20, %s962_s19 }
  0x2d   : > { %p54_p9 = scmp.ne.s32.totalorder %s962_s19, %s958_s18  ;;  %s1391_s26 = sadd.s32 1, %s982_s24 }
  0x2e   : > { %s1431_s11 = smov (%p32_p8, %s31_s11), 0  ;;  %s1433_s26 = smov (!%p32_p8, %s1391_s26), %s982_s24 }
  0x2f   : > { %1390 = sst [smem:[#allocation18_spill]] %s1431_s11  ;;  %s38_s7 = ssub.s32 %s978_s23, %s1431_s11 }
  0x30   : > { %p1143_p6 = por %p49_p0, %p48_p5  ;;  %p36_p10 = scmp.ge.s32.totalorder %s1433_s26, 2 }
  0x31   : > { %p39_p11 = scmp.eq.s32.totalorder %s38_s7, 0  ;;  %p1376_p12 = scmp.eq.s32.totalorder %s1126_s9, 0 }
  0x32   : > { %s158_s18 = sand.u32 1, %s966_s20   ;;  %s1435_s26 = smov (%p36_p10, %s1433_s26), 0 }
  0x33   : > { %1393 = sst [smem:[#allocation19_spill]] %s1435_s26  ;;  %p1156_p13 = por %p1376_p12, %p54_p9 }
  0x34   : > { %s1152_s30 = scalar_select %p39_p11, %s966_s20, %s41_s29  }
  0x35   : > { %s1162_s5 = ssub.s32 %s982_s24, %s1435_s26  ;;  %p1170_p1 = por %p82_p2, %p1376_p12 }
  0x36   : > { %1394 = sst [smem:[#allocation20_spill]] %s1152_s30  ;;  %s66_s27 = sor.u32 %s1162_s5, %s38_s7 }
  0x37   : > { %p67_p3 = scmp.eq.s32.totalorder %s66_s27, 0  ;;  %s584_s6 = sshll.u32 %s158_s18, 3 }
  0x38   : > { %s585_s1 = sshll.u32 %s978_s23, 7  ;;  %s1397_s29 = sadd.s32 1, %s954_s17 }
  0x39   : > { %s1178_s11 = scalar_select %p67_p3, %s954_s17, %s1397_s29  }
  0x3a   : > { %s1398_s0 = sld [smem:[#allocation21_spill]]  ;;  %s162_s26 = scalar_lea.vmem [#allocation3], %s584_s6 }
  0x3b   : > { %s169_s21 = sshll.u32 %s162_s26, 4  ;;  %p1187_p8 = pnand %p631_p4, %p1143_p6  ;;  %s170_s21 = int_to_ptr.vmem [resolvable:$true] %s169_s21 }
  0x3c   : > { %s159_s7 = scalar_lea.sflag [#allocation4], %s158_s18  ;;  %s791_s27 = scalar_lea.vmem %s170_s21, 128 }
  0x3d   : > { %p780_p2 = pneg %p1187_p8  ;;  %p792_p5 = scmp.ne.s32.totalorder %s170_s21, %s791_s27 }
  0x3e   : > { %s992_s29 = smov [#allocation3]  }
  0x3f   : > { %p794_p9 = pnand %p792_p5, %p780_p2  ;;  %s796_s20 = sshll.u32 %s992_s29, 4  ;;  %s797_s20 = int_to_ptr.vmem [resolvable:$false] %s796_s20 }
  0x40   : > { %s167_s22 = scalar_lea.hbm %s1398_s0, %s585_s1  ;;  %s798_s1 = scalar_lea.vmem %s797_s20, 256 }
  0x41   : > { %p795_p10 = pneg %p794_p9  ;;  %p799_p11 = scmp.lt.s32.totalorder %s170_s21, %s797_s20 }
  0x42   : > { %p800_p3 = scmp.lt.s32.totalorder %s798_s1, %s791_s27 }
  0x44   : > { %p801_p12 = por %p800_p3, %p799_p11 }
  0x46   : > { %p802_p6 = pnand %p801_p12, %p795_p10 }
  0x48   : > { %805 = shalt.err (!%p802_p6)
}
  0x49   : > { %620 = dma.hbm_to_vmem [thread:$0]  (!%p1187_p8), %s167_s22, 128, %s170_s21, %s159_s7  }
  0x4a   : > { %s581_s26 = sadd.s32 4294967294, %s986_s25   ;;  %p93_p2 = scmp.eq.s32.totalorder %s1162_s5, 0 }
  0x4b   : > { %s95_s10 = sadd.s32 1, %s942_s14  ;;  %p102_p12 = scmp.ne.s32.totalorder %s942_s14, %s938_s13 }
  0x4c   : > { %s1201_s18 = scalar_select %p93_p2, %s942_s14, %s95_s10  }
  0x4d   : > { %p1205_p5 = por %p102_p12, %p49_p0  ;;  %p108_p9 = scmp.ne.s32.totalorder %s938_s13, %s934_s12 }
  0x4e   : > { %p132_p10 = scmp.eq.s32.totalorder %s1126_s9, 3  ;;  %p138_p11 = scmp.eq.s32.totalorder %s581_s26, 3 }
  0x4f   : > { %p1401_p3 = scmp.eq.s32.totalorder %s1126_s9, 0  ;;  %s202_s21 = sand.u32 1, %s942_s14  }
  0x50   : > { %p1219_p8 = por %p132_p10, %p102_p12  ;;  %p1223_p2 = por %p138_p11, %p108_p9 }
  0x51   : > { %p1214_p6 = por %p108_p9, %p1401_p3  ;;  %s591_s15 = sshll.u32 %s202_s21, 1 }
  0x52   : > { %s1403_s22 = scalar_select %p1219_p8, 1, 0 }
  0x53   : > { %s1402_s6 = scalar_select %p1214_p6, 1, 0 }
  0x54   : > { %s1404_s5 = scalar_select %p1223_p2, 1, 0 }
  0x55   : > { %s607_s7 = sshll.u32 %s982_s24, 5  ;;  %s204_s1 = scalar_lea.vmem [#allocation8], %s591_s15 }
  0x56   : > { %s210_s20 = scalar_lea.hbm %s1370_s2, %s607_s7  ;;  %s212_s26 = sshll.u32 %s204_s1, 4  ;;  %s213_s26 = int_to_ptr.vmem [resolvable:$true] %s212_s26 }
  0x57   : > { %p1235_p0 = pnand %p631_p4, %p1205_p5  ;;  %s819_s0 = scalar_lea.vmem %s213_s26, 32 }
  0x58   : > { %p820_p9 = scmp.ne.s32.totalorder %s213_s26, %s819_s0  ;;  %s993_s21 = smov [#allocation8]  }
  0x59   : > { %p808_p12 = pneg %p1235_p0  ;;  %s824_s24 = sshll.u32 %s993_s21, 4  ;;  %s825_s24 = int_to_ptr.vmem [resolvable:$false] %s824_s24 }
  0x5a   : > { %s826_s7 = scalar_lea.vmem %s825_s24, 64  ;;  %p827_p3 = scmp.lt.s32.totalorder %s213_s26, %s825_s24 }
  0x5b   : > { %p822_p10 = pnand %p820_p9, %p808_p12  ;;  %p828_p2 = scmp.lt.s32.totalorder %s826_s7, %s819_s0 }
  0x5d   : > { %p823_p11 = pneg %p822_p10  ;;  %p829_p8 = por %p828_p2, %p827_p3 }
  0x5f   : > { %p830_p6 = pnand %p829_p8, %p823_p11 }
  0x61   : > { %833 = shalt.err (!%p830_p6)
}
  0x62   : > { %626 = dma.hbm_to_vmem [thread:$0]  (!%p1235_p0), %s210_s20, 32, %s213_s26, %s1111_s3  }
  0x63   : > { %221 = sbr.rel (%p1121_p7) target bundleno = 400 (0x190), region = 32  ;;  %s223_s30 = sand.u32 (!%p1121_p7), 1, %s962_s19  }
  0x64   : > { %s1247_s15 = sshll.u32 (!%p1121_p7), %s223_s30, 3  ;;  %s224_s27 = scalar_lea.sflag (!%p1121_p7), [#allocation4], %s223_s30 }
  0x65   : > { %s227_s29 = scalar_lea.vmem (!%p1121_p7), [#allocation3], %s1247_s15 }
  0x68   : > { %917 = dma.done.wait (%p1156_p13), %s224_s27, 128  }
  0x69   : > { %919 = vsyncadd (%p1156_p13), %s224_s27, 4294967168  ;;  %s232_s0 = sand.u32 1, %s1126_s9   ;;  %s234_s3 = sand.u32 1, %s950_s16  }
  0x6a   : > { %s596_s24 = sshll.u32 %s234_s3, 7  ;;  %s233_s8 = scalar_lea.sflag [#allocation7], %s232_s0 }
  0x6b   : > { %s1256_s20 = scalar_lea.vmem [#allocation6], %s596_s24 }
  0x6c   : > { %921 = dma.done.wait (%p1170_p1), %s233_s8, 2048  }
  0x6d   : > { %923 = vsyncadd (%p1170_p1), %s233_s8, 4294965248  ;;  %s1263_s1 = sand.u32 1, %s938_s13   ;;  %p1406_p4 = scmp.ne.s32.totalorder %s1402_s6, 0 }
  0x6e   : > { %s597_s4 = sshll.u32 %s1263_s1, 1 }
  0x6f   : > { %s1266_s26 = scalar_lea.vmem [#allocation8], %s597_s4 }
  0x70   : > { %925 = dma.done.wait (%p1406_p4), %s233_s8, 32  }
  0x71   : > { %927 = vsyncadd (%p1406_p4), %s233_s8, 4294967264  ;;  %s598_s9 = sshll.u32 %s1263_s1, 4  ;;  %s1407_s21 = sld [smem:[#allocation15_spill]] }
  0x72   : > { %s1273_s10 = scalar_lea.vmem [#allocation9], %s598_s9 }
  0x77   : > { %p599_p7 = scmp.ne.s32.totalorder %s1407_s21, 0 }
  0x79   : > { %285 = sbr.rel (%p599_p7) target bundleno = 128 (0x80), region = 48 }
  0x7e   : > { %v994_v0 = vmov 0.0  }
  0x7f   : > { %286 = vst [vmem:[#allocation2] sm:$0xff] %v994_v0  ;;  %287 = vst [vmem:[#allocation2 + $0x8] sm:$0xff] %v994_v0 }
  0x80 PF: > { %v306_v1 = vld [vmem:[%s1256_s20 + $0x78] sm:$0xff]  ;;  %v305_v2 = vld [vmem:[%s1256_s20 + $0x70] sm:$0xff]  ;;  %v304_v3 = vld [vmem:[%s1256_s20 + $0x68] sm:$0xff]  ;;  %v995_v7 = vmov 0.0   ;;  %s1408_s28 = sld [smem:[#allocation15_spill]] }
  0x81   : > { %v338_v4 = vunpack.c.h.bf16 %v306_v1  ;;  %v337_v5 = vunpack.c.l.bf16 %v306_v1  ;;  %v336_v6 = vunpack.c.h.bf16 %v305_v2  ;;  %403 = vmatprep.mubr.f32.mxu0 %v995_v7  ;;  %v335_v8 = vunpack.c.l.bf16 %v305_v2  ;;  %v303_v9 = vld [vmem:[%s1256_s20 + $0x60] sm:$0xff]  ;;  %v302_v12 = vld [vmem:[%s1256_s20 + $0x58] sm:$0xff]  ;;  %v301_v15 = vld [vmem:[%s1256_s20 + $0x50] sm:$0xff] }
  0x82   : > { %v334_v10 = vunpack.c.h.bf16 %v304_v3  ;;  %v333_v11 = vunpack.c.l.bf16 %v304_v3  ;;  %v332_v13 = vunpack.c.h.bf16 %v303_v9  ;;  %v331_v14 = vunpack.c.l.bf16 %v303_v9  ;;  %v300_v18 = vld [vmem:[%s1256_s20 + $0x48] sm:$0xff]  ;;  %v299_v21 = vld [vmem:[%s1256_s20 + $0x40] sm:$0xff]  ;;  %v298_v24 = vld [vmem:[%s1256_s20 + $0x38] sm:$0xff] }
  0x83   : > { %339 = vmatprep.subr.mxu0 %v338_v4  ;;  %v330_v16 = vunpack.c.h.bf16 %v302_v12  ;;  %v329_v17 = vunpack.c.l.bf16 %v302_v12  ;;  %v328_v19 = vunpack.c.h.bf16 %v301_v15  ;;  %v327_v20 = vunpack.c.l.bf16 %v301_v15  ;;  %v297_v27 = vld [vmem:[%s1256_s20 + $0x30] sm:$0xff]  ;;  %v296_v30 = vld [vmem:[%s1256_s20 + $0x28] sm:$0xff]  ;;  %v295_v33 = vld [vmem:[%s1256_s20 + $0x20] sm:$0xff] }
  0x84   : > { %340 = vmatpush1.msra.mxu0 %v337_v5  ;;  %v326_v22 = vunpack.c.h.bf16 %v300_v18  ;;  %v325_v23 = vunpack.c.l.bf16 %v300_v18  ;;  %v324_v25 = vunpack.c.h.bf16 %v299_v21  ;;  %v323_v26 = vunpack.c.l.bf16 %v299_v21  ;;  %v294_v36 = vld [vmem:[%s1256_s20 + $0x18] sm:$0xff]  ;;  %v293_v39 = vld [vmem:[%s1256_s20 + $0x10] sm:$0xff]  ;;  %v292_v42 = vld [vmem:[%s1256_s20 + $0x8] sm:$0xff] }
  0x85   : > { %341 = vmatprep.subr.mxu0 %v336_v6  ;;  %v322_v28 = vunpack.c.h.bf16 %v298_v24  ;;  %v321_v29 = vunpack.c.l.bf16 %v298_v24  ;;  %v320_v31 = vunpack.c.h.bf16 %v297_v27  ;;  %v319_v32 = vunpack.c.l.bf16 %v297_v27  ;;  %v291_v45 = vld [vmem:[%s1256_s20] sm:$0xff]  ;;  %v290_v50 = vld [vmem:[%s227_s29] sm:$0xff] }
  0x86   : > { %342 = vmatpush1.msra.mxu0 %v335_v8  ;;  %v318_v34 = vunpack.c.h.bf16 %v296_v30  ;;  %v317_v35 = vunpack.c.l.bf16 %v296_v30  ;;  %v316_v37 = vunpack.c.h.bf16 %v295_v33  ;;  %v315_v38 = vunpack.c.l.bf16 %v295_v33  ;;  %v288_v51 = vld [vmem:[#allocation2] sm:$0xff]  ;;  %v289_v53 = vld [vmem:[#allocation2 + $0x8] sm:$0xff]  ;;  %p600_p13 = scmp.ne.s32.totalorder %s1408_s28, 1 }
  0x87   : > { %343 = vmatprep.subr.mxu0 %v334_v10  ;;  %v314_v40 = vunpack.c.h.bf16 %v294_v36  ;;  %v313_v41 = vunpack.c.l.bf16 %v294_v36  ;;  %v312_v43 = vunpack.c.h.bf16 %v293_v39  ;;  %v311_v44 = vunpack.c.l.bf16 %v293_v39 }
  0x88   : > { %344 = vmatpush1.msra.mxu0 %v333_v11  ;;  %v310_v46 = vunpack.c.h.bf16 %v292_v42  ;;  %v309_v47 = vunpack.c.l.bf16 %v292_v42  ;;  %v308_v48 = vunpack.c.h.bf16 %v291_v45  ;;  %v307_v49 = vunpack.c.l.bf16 %v291_v45 }
  0x89   : > { %345 = vmatprep.subr.mxu0 %v332_v13 }
  0x8a   : > { %346 = vmatpush1.msra.mxu0 %v331_v14 }
  0x8b   : > { %347 = vmatprep.subr.mxu0 %v330_v16 }
  0x8c   : > { %348 = vmatpush1.msra.mxu0 %v329_v17 }
  0x8d   : > { %349 = vmatprep.subr.mxu0 %v328_v19 }
  0x8e   : > { %350 = vmatpush1.msra.mxu0 %v327_v20 }
  0x8f   : > { %351 = vmatprep.subr.mxu0 %v326_v22 }
  0x90   : > { %352 = vmatpush1.msra.mxu0 %v325_v23 }
  0x91   : > { %353 = vmatprep.subr.mxu0 %v324_v25 }
  0x92   : > { %354 = vmatpush1.msra.mxu0 %v323_v26 }
  0x93   : > { %355 = vmatprep.subr.mxu0 %v322_v28 }
  0x94   : > { %356 = vmatpush1.msra.mxu0 %v321_v29 }
  0x95   : > { %357 = vmatprep.subr.mxu0 %v320_v31 }
  0x96   : > { %358 = vmatpush1.msra.mxu0 %v319_v32 }
  0x97   : > { %359 = vmatprep.subr.mxu0 %v318_v34 }
  0x98   : > { %360 = vmatpush1.msra.mxu0 %v317_v35 }
  0x99   : > { %361 = vmatprep.subr.mxu0 %v316_v37 }
  0x9a   : > { %362 = vmatpush1.msra.mxu0 %v315_v38 }
  0x9b   : > { %363 = vmatprep.subr.mxu0 %v314_v40 }
  0x9c   : > { %364 = vmatpush1.msra.mxu0 %v313_v41 }
  0x9d   : > { %365 = vmatprep.subr.mxu0 %v312_v43 }
  0x9e   : > { %366 = vmatpush1.msra.mxu0 %v311_v44 }
  0x9f   : > { %367 = vmatprep.subr.mxu0 %v310_v46 }
  0xa0   : > { %368 = vmatpush1.msra.mxu0 %v309_v47 }
  0xa1   : > { %369 = vmatprep.subr.mxu0 %v308_v48 }
  0xa2   : > { %370 = vmatpush1.msra.mxu0 %v307_v49 }
  0xa3   : > { %404 = vmatmul.mubr.f32.vlgmr.msra.gmra.mxu0 %v290_v50 }
 0x163   : > { %v405_v52 = vpop.f32.mrf.mxu0 }
 0x164   : > { %v410_v54 = vadd.f32 %v405_v52, %v288_v51  ;;  %417 = sbr.rel (%p600_p13) target bundleno = 374 (0x176), region = 52 }
 0x165   : > { %v407_v55 = vpop.f32.mrf.mxu0 }
 0x166   : > { %412 = vst [vmem:[#allocation2] sm:$0xff] %v410_v54  ;;  %v411_v56 = vadd.f32 %v407_v55, %v289_v53 }
 0x168   : > { %413 = vst [vmem:[#allocation2 + $0x8] sm:$0xff] %v411_v56 }
 0x169   : > { %v422_v57 = vlaneseq  ;;  %v420_v59 = vld [vmem:[%s1266_s26] sm:$0x3] }
 0x16b   : > { %v423_v58 = vshrl.u32 %v422_v57, 7 }
 0x16d   : > { %v424_v60 = vsub.s32 0, %v423_v58  ;;  %v428_v61 = vsub.s32 1, %v423_v58  ;;  %v418_v62 = vld [vmem:[#allocation2] sm:$0xff] }
 0x16f   : > { %v419_v63 = vld [vmem:[#allocation2 + $0x8] sm:$0xff]  ;;  %v425_v0 = vrot.slane %v420_v59, %v424_v60  ;;  %v429_v1 = vrot.slane %v420_v59, %v428_v61 }
 0x171   : > { %v432_v2 = vadd.f32 %v425_v0, %v418_v62  ;;  %v433_v3 = vadd.f32 %v429_v1, %v419_v63 }
 0x173   : > { %v434_v4 = vmax.f32 %v432_v2, 0.0  ;;  %v435_v5 = vmax.f32 %v433_v3, 0.0 }
 0x175   : > { %436 = vst [vmem:[%s1273_s10] sm:$0xff] %v434_v4  ;;  %437 = vst [vmem:[%s1273_s10 + $0x8] sm:$0xff] %v435_v5 }
 0x176 PF: > { %s1409_s6 = sld [smem:[#allocation16_spill]]  ;;  %s453_s0 = sshll.u32 %s1273_s10, 4  ;;  %s454_s0 = int_to_ptr.vmem [resolvable:$true] %s453_s0 }
 0x177   : > { %s1410_s27 = sld [smem:[#allocation23_spill]]  ;;  %s439_s3 = scalar_lea.sflag [#allocation5], %s1263_s1 }
 0x178   : > { %s834_s24 = scalar_lea.vmem %s454_s0, 256  ;;  %p1411_p5 = scmp.ne.s32.totalorder %s1403_s22, 0 }
 0x179   : > { %p835_p1 = scmp.ne.s32.totalorder %s454_s0, %s834_s24  ;;  %s996_s8 = smov [#allocation9]  }
 0x17a   : > { %s838_s20 = sshll.u32 %s996_s8, 4  ;;  %s839_s20 = int_to_ptr.vmem [resolvable:$false] %s838_s20 }
 0x17b   : > { %p836_p6 = pnand %p835_p1, %p1411_p5  ;;  %s840_s4 = scalar_lea.vmem %s839_s20, 512 }
 0x17c   : > { %s608_s7 = sshll.u32 %s1409_s6, 8  ;;  %p841_p2 = scmp.lt.s32.totalorder %s454_s0, %s839_s20 }
 0x17d   : > { %s451_s29 = scalar_lea.hbm %s1410_s27, %s608_s7  ;;  %p837_p8 = pneg %p836_p6 }
 0x17e   : > { %p842_p0 = scmp.lt.s32.totalorder %s840_s4, %s834_s24 }
 0x180   : > { %p843_p12 = por %p842_p0, %p841_p2 }
 0x182   : > { %p844_p9 = pnand %p843_p12, %p837_p8 }
 0x184   : > { %847 = shalt.err (!%p844_p9)
}
 0x185   : > { %s848_s26 = scalar_lea.hbm %s451_s29, 256  ;;  %s852_s10 = scalar_lea.hbm %s1410_s27, 512 }
 0x186   : > { %p849_p10 = scmp.ne.s32.totalorder %s451_s29, %s848_s26  ;;  %p853_p4 = scmp.lt.s32.totalorder %s451_s29, %s1410_s27 }
 0x187   : > { %p854_p7 = scmp.lt.s32.totalorder %s852_s10, %s848_s26 }
 0x188   : > { %p850_p11 = pnand %p849_p10, %p1411_p5 }
 0x189   : > { %p855_p13 = por %p854_p7, %p853_p4 }
 0x18a   : > { %p851_p3 = pneg %p850_p11 }
 0x18c   : > { %p856_p1 = pnand %p855_p13, %p851_p3 }
 0x18e   : > { %859 = shalt.err (!%p856_p1)
}
 0x18f   : > { %615 = dma.vmem_to_hbm [thread:$0]  (%p1411_p5), %s454_s0, 256, %s451_s29, %s439_s3  }
 0x190 PF: > { %p632_p6 = scmp.ge.s32.totalorder %s986_s25, 2  ;;  %s465_s6 = sand.u32 1, %s934_s12  }
 0x191   : > { %p1412_p8 = scmp.ne.s32.totalorder %s1404_s5, 0  ;;  %s466_s7 = scalar_lea.sflag [#allocation5], %s465_s6 }
 0x193   : > { %p628_p2 = pnand %p632_p6, %p1412_p8 }
 0x195   : > { %p629_p0 = pneg %p628_p2 }
 0x197   : > { %929 = dma.done.wait (%p629_p0), %s466_s7, 256  }
 0x198   : > { %931 = vsyncadd (%p629_p0), %s466_s7, 4294967040  ;;  %s22_s25 = sadd.s32 1, %s986_s25   ;;  %s1414_s22 = sld [smem:[#allocation14_spill]] }
 0x199   : > { %p1321_p12 = scmp.ge.s32.totalorder %s22_s25, 6   ;;  %s1415_s20 = sld [smem:[#allocation20_spill]] }
 0x19a   : > { %s1416_s5 = sld [smem:[#allocation17_spill]]  ;;  %s1419_s12 = smov %s938_s13 }
 0x19b   : > { %s1417_s29 = sld [smem:[#allocation18_spill]]  ;;  %s1420_s13 = smov %s942_s14 }
 0x19c   : > { %s1418_s24 = sld [smem:[#allocation19_spill]]  ;;  %s1421_s14 = smov %s1201_s18 }
 0x19d   : > { %s1422_s15 = smov %s950_s16  ;;  %s1423_s16 = smov %s954_s17 }
 0x19e   : > { %s1424_s17 = smov %s1178_s11  ;;  %s1425_s18 = smov %s962_s19 }
 0x19f   : > { %s1426_s19 = smov %s1414_s22  ;;  %s1427_s21 = smov %s978_s23 }
 0x1a0   : > { %s1428_s22 = smov %s1416_s5  ;;  %21 = sbr.rel (!%p1321_p12) target bundleno = 16 (0x10), region = 109 }
 0x1a1   : > { %s1429_s23 = smov %s1417_s29 }
 0x1a5   :  { %471 = vsyncpa [#allocation4], 1 }
 0x1a6   :  { %473 = vsyncpa [#allocation4 + $0x1], 1 }
 0x1a7   :  { %474 = vsyncpa [#allocation7], 1 }
 0x1a8   :  { %476 = vsyncpa [#allocation7 + $0x1], 1 }
 0x1a9   :  { %477 = vsyncpa [#allocation5], 1 }
 0x1aa   :  { %479 = vsyncpa [#allocation5 + $0x1], 1 }

</bundles_post_ra>
